<compile_context>
chip_gen: v7x
topology: tpu7x:2x2x1
jax: 0.10.0
libtpu: 0.0.40
codegen_flags: <defaults>
</compile_context>

<pallas_src>
import numpy as np
import jax
import jax.numpy as jnp
from jax.experimental import pallas as pl
from jax.experimental.pallas import tpu as pltpu


# ----------------------------------------------------------------------------
# Pallas kernel: one grid step = one (batch, channel-group) slab, all cutouts.
#   x_ref   : (1, Tc, H, W)          f32  image slab (cast to bf16 in-kernel)
#   wy_ref  : (cutn*Pp, H)           bf16 row-pool weights, all cutouts stacked
#   wxT_ref : (cutn, W, Pq)          bf16 col-pool weights, pre-transposed
#   o_ref   : (cutn, 1, Tc, Pp, Pq)  f32  lane-dense output block
#   t1_ref  : (cutn, Tc*Pp, W)       bf16 VMEM scratch (row-pooled slabs)
# ----------------------------------------------------------------------------
def _cutout_pool_kernel(x_ref, wy_ref, wxT_ref, o_ref, t1_ref):
    cutn, _, Tc, Pp, Pq = o_ref.shape
    wy_all = wy_ref[...]                                   # resident weights
    # matmul-1: one (cutn*Pp, H) @ (H, W) MXU dot per channel.  Rows for cutout
    # n land in t1[n*Pp:(n+1)*Pp]; stage them into the scratch keyed
    # [cutout][channel] so matmul-2 can stack channels along M.  All indices
    # are static; t1 is consumed immediately, so only one t1 is live.
    for c in range(Tc):
        xim = x_ref[0, c].astype(jnp.bfloat16)             # in-kernel f32->bf16
        t1 = jnp.dot(wy_all, xim,
                     preferred_element_type=jnp.float32).astype(jnp.bfloat16)
        for n in range(cutn):
            t1_ref[n, c * Pp:(c + 1) * Pp, :] = t1[n * Pp:(n + 1) * Pp, :]
    # matmul-2: per cutout, channels stacked along M -> (Tc*Pp, W) @ (W, Pq),
    # f32 accumulation, then unstack rows into the output block.
    for n in range(cutn):
        t2 = jnp.dot(t1_ref[n], wxT_ref[n],
                     preferred_element_type=jnp.float32)   # (Tc*Pp, Pq) f32
        for c in range(Tc):
            o_ref[n, 0, c] = t2[c * Pp:(c + 1) * Pp, :]


def _pick_tc(C, Pp, H, W):
    """Channels grouped per grid step: Tc*Pp rows feed matmul-2's M dimension.
    Target ~256 rows (v6e/v7x MXU tile; >=128 already saturates v5e) while
    keeping the f32 x block modest so v7x's 64 MiB VMEM is never at risk."""
    best = 1
    for tc in range(1, C + 1):
        if C % tc:
            continue
        if tc > 1 and (tc * Pp > 256 or tc * H * W * 4 > (8 << 20)):
            break
        best = tc
    return best


def make_cutouts_pallas(x, wy_all, wxT, cut_size):
    """x: (B, C, H, W) f32; wy_all: (cutn*Pp, H) bf16; wxT: (cutn, W, Pq) bf16.
    Returns (cutn * B, C, cut_size, cut_size) f32, matching torch.cat order."""
    B, C, H, W = x.shape
    cutn, _, Pq = wxT.shape
    Pp = wy_all.shape[0] // cutn
    Tc = _pick_tc(C, Pp, H, W)

    flops = 2 * B * C * cutn * Pp * (H * W + W * Pq)
    bytes_accessed = (B * C * H * W * 4              # x (f32), read once
                      + cutn * Pp * H * 2            # wy (bf16), resident
                      + cutn * W * Pq * 2            # wxT (bf16), resident
                      + cutn * B * C * Pp * Pq * 4)  # output (f32)

    # VMEM budget from actual block shapes (pipeline double-buffers blocks;
    # weights have constant index_maps but are budgeted x2 to be safe), plus
    # headroom for t2 / compiler-internal scratch.
    need = (2 * Tc * H * W * 4              # x block (f32)
            + 2 * cutn * Pp * H * 2         # wy
            + 2 * cutn * W * Pq * 2         # wxT
            + 2 * cutn * Tc * Pp * Pq * 4   # output block (f32)
            + cutn * Tc * Pp * W * 2)       # t1 scratch (bf16)
    vmem_limit = int(min(max(2 * need + (4 << 20), 16 << 20), 60 << 20))

    out = pl.pallas_call(
        _cutout_pool_kernel,
        out_shape=jax.ShapeDtypeStruct((cutn, B, C, Pp, Pq), jnp.float32),
        grid_spec=pltpu.PrefetchScalarGridSpec(
            num_scalar_prefetch=0,
            grid=(B, C // Tc),
            in_specs=[
                pl.BlockSpec((1, Tc, H, W), lambda b, c: (b, c, 0, 0)),
                # Constant index_maps: weights DMA'd once, stay resident.
                pl.BlockSpec((cutn * Pp, H), lambda b, c: (0, 0)),
                pl.BlockSpec((cutn, W, Pq), lambda b, c: (0, 0, 0)),
            ],
            out_specs=pl.BlockSpec((cutn, 1, Tc, Pp, Pq),
                                   lambda b, c: (0, b, c, 0, 0)),
            scratch_shapes=[pltpu.VMEM((cutn, Tc * Pp, W), jnp.bfloat16)],
        ),
        compiler_params=pltpu.CompilerParams(
            dimension_semantics=("parallel", "parallel"),
            vmem_limit_bytes=vmem_limit),
        cost_estimate=pl.CostEstimate(flops=flops, transcendentals=0,
                                      bytes_accessed=bytes_accessed),
    )(x, wy_all, wxT)

    # Strip alignment padding, then match torch.cat ordering (index = n*B + b).
    # TODO(synk): for cut_size << 128 the Pq padding inflates output writeback;
    # lane-packing several cutouts per 128-lane block would avoid it.
    out = out[:, :, :, :cut_size, :cut_size]
    return out.reshape(cutn * B, C, cut_size, cut_size)


# ----------------------------------------------------------------------------
# Host-side glue: random cutout sizes/offsets + adaptive-avg-pool weights.
# ----------------------------------------------------------------------------
def _round_up(v, m):
    return ((v + m - 1) // m) * m


def _build_pool_weight(sizes, offsets, side, cut_size, pad_rows):
    """W[n, i, j] = 1/len(window_i) inside (offset + adaptive window i);
    rows cut_size..pad_rows-1 are zero padding (contribute exact zeros)."""
    w = np.zeros((len(sizes), pad_rows, side), np.float32)
    for n, (sz, off) in enumerate(zip(sizes, offsets)):
        for i in range(cut_size):
            s = (i * sz) // cut_size                     # floor(i*sz/cs)
            e = -((-(i + 1) * sz) // cut_size)           # ceil((i+1)*sz/cs)
            w[n, i, off + s: off + e] = 1.0 / float(e - s)
    return w


def build_cutout_weights(sizes, offx, offy, sideY, sideX, cut_size):
    """Returns (wy_all, wxT) in bf16 with MXU/lane-friendly padding:
       wy_all : (cutn*Pp, sideY), Pp = round_up(cut_size, 8), cutouts stacked
       wxT    : (cutn, sideX, Pq), Pq = round_up(cut_size, 128), pre-transposed."""
    cutn = len(sizes)
    Pp = _round_up(cut_size, 8)      # sublane / matmul-M padding
    Pq = _round_up(cut_size, 128)    # lane padding -> lane-dense output stores
    wy = _build_pool_weight(sizes, offy, sideY, cut_size, Pp)       # (cutn, Pp, H)
    wy_all = wy.reshape(cutn * Pp, sideY)                           # stacked
    wx = _build_pool_weight(sizes, offx, sideX, cut_size, Pq)       # (cutn, Pq, W)
    wxT = np.ascontiguousarray(np.transpose(wx, (0, 2, 1)))         # (cutn, W, Pq)
    return (jnp.asarray(wy_all, dtype=jnp.bfloat16),
            jnp.asarray(wxT, dtype=jnp.bfloat16))


def sample_cutout_params(key, sideY, sideX, cut_size, cutn, cut_pow):
    """Reproduces the random-draw semantics of MakeCutouts.forward
    (size = int(rand()**cut_pow * (max-min) + min), uniform offsets)."""
    # TODO(synk): torch.rand/torch.randint draws are host-side here; bitwise
    # per-seed parity with PyTorch is not reproduced (semantics are).
    max_size = min(sideX, sideY)
    min_size = min(sideX, sideY, cut_size)
    sizes, offx, offy = [], [], []
    for _ in range(cutn):
        key, k1, k2, k3 = jax.random.split(key, 4)
        u = float(jax.random.uniform(k1, ()))
        size = int((u ** cut_pow) * (max_size - min_size) + min_size)
        ox = int(jax.random.randint(k2, (), 0, sideX - size + 1))
        oy = int(jax.random.randint(k3, (), 0, sideY - size + 1))
        sizes.append(size)
        offx.append(ox)
        offy.append(oy)
    return sizes, offx, offy


def numpy_reference(x, sizes, offx, offy, cut_size):
    """Pure-numpy crop + adaptive_avg_pool2d reference (f32)."""
    x = np.asarray(x)
    outs = []
    for sz, ox, oy in zip(sizes, offx, offy):
        cut = x[:, :, oy:oy + sz, ox:ox + sz]
        B, C, _, _ = cut.shape
        o = np.zeros((B, C, cut_size, cut_size), np.float32)
        for i in range(cut_size):
            ys = (i * sz) // cut_size
            ye = -((-(i + 1) * sz) // cut_size)
            for j in range(cut_size):
                xs = (j * sz) // cut_size
                xe = -((-(j + 1) * sz) // cut_size)
                o[:, :, i, j] = cut[:, :, ys:ye, xs:xe].mean(axis=(2, 3))
        outs.append(o)
    return np.concatenate(outs, axis=0)


if __name__ == "__main__":
    B, C, H, W = 2, 4, 16, 16
    cut_size, cutn, cut_pow = 8, 4, 1.0

    key = jax.random.PRNGKey(0)
    kx, kparams = jax.random.split(key)
    x = jax.random.normal(kx, (B, C, H, W), dtype=jnp.float32)

    sizes, offx, offy = sample_cutout_params(kparams, H, W, cut_size, cutn, cut_pow)
    wy_all, wxT = build_cutout_weights(sizes, offx, offy, H, W, cut_size)

    out = make_cutouts_pallas(x, wy_all, wxT, cut_size)
    out = jax.block_until_ready(out)

    ref = numpy_reference(x, sizes, offx, offy, cut_size)
    # Tolerance reflects bf16 operands (accumulation stays f32 in the kernel).
    np.testing.assert_allclose(np.asarray(out), ref, rtol=2e-2, atol=2e-2)

    print("KERNEL_OK")
</pallas_src>

<mosaic_0001>
module attributes {stable_mosaic.version = 11 : i64} {
  func.func @_cutout_pool_kernel(%arg0: i32, %arg1: i32, %arg2: memref<1x4x16x16xf32, #tpu.memory_space<vmem>>, %arg3: memref<32x16xbf16, #tpu.memory_space<vmem>>, %arg4: memref<4x16x128xbf16, #tpu.memory_space<vmem>>, %arg5: memref<4x1x4x8x128xf32, #tpu.memory_space<vmem>>, %arg6: memref<4x32x16xbf16, #tpu.memory_space<vmem>>) attributes {dimension_semantics = [#tpu.dimension_semantics<parallel>, #tpu.dimension_semantics<parallel>], iteration_bounds = array<i64: 2, 1>, scalar_prefetch = 0 : i64, scratch_operands = 1 : i64, tpu.core_type = #tpu.core_type<tc>, window_params = [{transform_indices = @transform_0, window_bounds = array<i64: 1, 4, 16, 16>}, {pipeline_mode = #tpu.pipeline_mode<synchronous>, transform_indices = @transform_1, window_bounds = array<i64: 32, 16>}, {pipeline_mode = #tpu.pipeline_mode<synchronous>, transform_indices = @transform_2, window_bounds = array<i64: 4, 16, 128>}, {transform_indices = @transform_3, window_bounds = array<i64: 4, 1, 4, 8, 128>}]} {
    %c0 = arith.constant 0 : index
    %c0_0 = arith.constant 0 : index
    %0 = vector.load %arg3[%c0, %c0_0] : memref<32x16xbf16, #tpu.memory_space<vmem>>, vector<32x16xbf16>
    %c0_1 = arith.constant 0 : index
    %c0_2 = arith.constant 0 : index
    %c0_3 = arith.constant 0 : index
    %c0_4 = arith.constant 0 : index
    %1 = vector.load %arg2[%c0_1, %c0_2, %c0_3, %c0_4] : memref<1x4x16x16xf32, #tpu.memory_space<vmem>>, vector<1x1x16x16xf32>
    %2 = vector.shape_cast %1 : vector<1x1x16x16xf32> to vector<16x16xf32>
    %3 = arith.truncf %2 : vector<16x16xf32> to vector<16x16xbf16>
    %cst = arith.constant dense<0.000000e+00> : vector<32x16xf32>
    %4 = tpu.matmul %0, %3, %cst {dimension_numbers = #tpu.dot_dimension_numbers<[1], [0], [0], [1], [0, 0, 1, 1], [], []>} : vector<32x16xbf16>, vector<16x16xbf16>, vector<32x16xf32> -> vector<32x16xf32>
    %5 = arith.truncf %4 : vector<32x16xf32> to vector<32x16xbf16>
    %6 = vector.extract_strided_slice %5 {offsets = [0, 0], sizes = [8, 16], strides = [1, 1]} : vector<32x16xbf16> to vector<8x16xbf16>
    %c0_5 = arith.constant 0 : index
    %c0_6 = arith.constant 0 : index
    %c0_7 = arith.constant 0 : index
    %7 = vector.load %arg6[%c0_5, %c0_6, %c0_7] : memref<4x32x16xbf16, #tpu.memory_space<vmem>>, vector<1x8x16xbf16>
    %8 = vector.shape_cast %7 : vector<1x8x16xbf16> to vector<8x16xbf16>
    %9 = vector.shape_cast %6 : vector<8x16xbf16> to vector<1x8x16xbf16>
    tpu.vector_store %arg6[%c0_5, %c0_6, %c0_7], %9 {strides = array<i32>} : memref<4x32x16xbf16, #tpu.memory_space<vmem>>, vector<1x8x16xbf16>,
    %10 = vector.extract_strided_slice %5 {offsets = [8, 0], sizes = [8, 16], strides = [1, 1]} : vector<32x16xbf16> to vector<8x16xbf16>
    %c1 = arith.constant 1 : index
    %c0_8 = arith.constant 0 : index
    %c0_9 = arith.constant 0 : index
    %11 = vector.load %arg6[%c1, %c0_8, %c0_9] : memref<4x32x16xbf16, #tpu.memory_space<vmem>>, vector<1x8x16xbf16>
    %12 = vector.shape_cast %11 : vector<1x8x16xbf16> to vector<8x16xbf16>
    %13 = vector.shape_cast %10 : vector<8x16xbf16> to vector<1x8x16xbf16>
    tpu.vector_store %arg6[%c1, %c0_8, %c0_9], %13 {strides = array<i32>} : memref<4x32x16xbf16, #tpu.memory_space<vmem>>, vector<1x8x16xbf16>,
    %14 = vector.extract_strided_slice %5 {offsets = [16, 0], sizes = [8, 16], strides = [1, 1]} : vector<32x16xbf16> to vector<8x16xbf16>
    %c2 = arith.constant 2 : index
    %c0_10 = arith.constant 0 : index
    %c0_11 = arith.constant 0 : index
    %15 = vector.load %arg6[%c2, %c0_10, %c0_11] : memref<4x32x16xbf16, #tpu.memory_space<vmem>>, vector<1x8x16xbf16>
    %16 = vector.shape_cast %15 : vector<1x8x16xbf16> to vector<8x16xbf16>
    %17 = vector.shape_cast %14 : vector<8x16xbf16> to vector<1x8x16xbf16>
    tpu.vector_store %arg6[%c2, %c0_10, %c0_11], %17 {strides = array<i32>} : memref<4x32x16xbf16, #tpu.memory_space<vmem>>, vector<1x8x16xbf16>,
    %18 = vector.extract_strided_slice %5 {offsets = [24, 0], sizes = [8, 16], strides = [1, 1]} : vector<32x16xbf16> to vector<8x16xbf16>
    %c3 = arith.constant 3 : index
    %c0_12 = arith.constant 0 : index
    %c0_13 = arith.constant 0 : index
    %19 = vector.load %arg6[%c3, %c0_12, %c0_13] : memref<4x32x16xbf16, #tpu.memory_space<vmem>>, vector<1x8x16xbf16>
    %20 = vector.shape_cast %19 : vector<1x8x16xbf16> to vector<8x16xbf16>
    %21 = vector.shape_cast %18 : vector<8x16xbf16> to vector<1x8x16xbf16>
    tpu.vector_store %arg6[%c3, %c0_12, %c0_13], %21 {strides = array<i32>} : memref<4x32x16xbf16, #tpu.memory_space<vmem>>, vector<1x8x16xbf16>,
    %c0_14 = arith.constant 0 : index
    %c1_15 = arith.constant 1 : index
    %c0_16 = arith.constant 0 : index
    %c0_17 = arith.constant 0 : index
    %22 = vector.load %arg2[%c0_14, %c1_15, %c0_16, %c0_17] : memref<1x4x16x16xf32, #tpu.memory_space<vmem>>, vector<1x1x16x16xf32>
    %23 = vector.shape_cast %22 : vector<1x1x16x16xf32> to vector<16x16xf32>
    %24 = arith.truncf %23 : vector<16x16xf32> to vector<16x16xbf16>
    %cst_18 = arith.constant dense<0.000000e+00> : vector<32x16xf32>
    %25 = tpu.matmul %0, %24, %cst_18 {dimension_numbers = #tpu.dot_dimension_numbers<[1], [0], [0], [1], [0, 0, 1, 1], [], []>} : vector<32x16xbf16>, vector<16x16xbf16>, vector<32x16xf32> -> vector<32x16xf32>
    %26 = arith.truncf %25 : vector<32x16xf32> to vector<32x16xbf16>
    %27 = vector.extract_strided_slice %26 {offsets = [0, 0], sizes = [8, 16], strides = [1, 1]} : vector<32x16xbf16> to vector<8x16xbf16>
    %c0_19 = arith.constant 0 : index
    %c8 = arith.constant 8 : index
    %c0_20 = arith.constant 0 : index
    %28 = vector.load %arg6[%c0_19, %c8, %c0_20] : memref<4x32x16xbf16, #tpu.memory_space<vmem>>, vector<1x8x16xbf16>
    %29 = vector.shape_cast %28 : vector<1x8x16xbf16> to vector<8x16xbf16>
    %30 = vector.shape_cast %27 : vector<8x16xbf16> to vector<1x8x16xbf16>
    tpu.vector_store %arg6[%c0_19, %c8, %c0_20], %30 {strides = array<i32>} : memref<4x32x16xbf16, #tpu.memory_space<vmem>>, vector<1x8x16xbf16>,
    %31 = vector.extract_strided_slice %26 {offsets = [8, 0], sizes = [8, 16], strides = [1, 1]} : vector<32x16xbf16> to vector<8x16xbf16>
    %c1_21 = arith.constant 1 : index
    %c8_22 = arith.constant 8 : index
    %c0_23 = arith.constant 0 : index
    %32 = vector.load %arg6[%c1_21, %c8_22, %c0_23] : memref<4x32x16xbf16, #tpu.memory_space<vmem>>, vector<1x8x16xbf16>
    %33 = vector.shape_cast %32 : vector<1x8x16xbf16> to vector<8x16xbf16>
    %34 = vector.shape_cast %31 : vector<8x16xbf16> to vector<1x8x16xbf16>
    tpu.vector_store %arg6[%c1_21, %c8_22, %c0_23], %34 {strides = array<i32>} : memref<4x32x16xbf16, #tpu.memory_space<vmem>>, vector<1x8x16xbf16>,
    %35 = vector.extract_strided_slice %26 {offsets = [16, 0], sizes = [8, 16], strides = [1, 1]} : vector<32x16xbf16> to vector<8x16xbf16>
    %c2_24 = arith.constant 2 : index
    %c8_25 = arith.constant 8 : index
    %c0_26 = arith.constant 0 : index
    %36 = vector.load %arg6[%c2_24, %c8_25, %c0_26] : memref<4x32x16xbf16, #tpu.memory_space<vmem>>, vector<1x8x16xbf16>
    %37 = vector.shape_cast %36 : vector<1x8x16xbf16> to vector<8x16xbf16>
    %38 = vector.shape_cast %35 : vector<8x16xbf16> to vector<1x8x16xbf16>
    tpu.vector_store %arg6[%c2_24, %c8_25, %c0_26], %38 {strides = array<i32>} : memref<4x32x16xbf16, #tpu.memory_space<vmem>>, vector<1x8x16xbf16>,
    %39 = vector.extract_strided_slice %26 {offsets = [24, 0], sizes = [8, 16], strides = [1, 1]} : vector<32x16xbf16> to vector<8x16xbf16>
    %c3_27 = arith.constant 3 : index
    %c8_28 = arith.constant 8 : index
    %c0_29 = arith.constant 0 : index
    %40 = vector.load %arg6[%c3_27, %c8_28, %c0_29] : memref<4x32x16xbf16, #tpu.memory_space<vmem>>, vector<1x8x16xbf16>
    %41 = vector.shape_cast %40 : vector<1x8x16xbf16> to vector<8x16xbf16>
    %42 = vector.shape_cast %39 : vector<8x16xbf16> to vector<1x8x16xbf16>
    tpu.vector_store %arg6[%c3_27, %c8_28, %c0_29], %42 {strides = array<i32>} : memref<4x32x16xbf16, #tpu.memory_space<vmem>>, vector<1x8x16xbf16>,
    %c0_30 = arith.constant 0 : index
    %c2_31 = arith.constant 2 : index
    %c0_32 = arith.constant 0 : index
    %c0_33 = arith.constant 0 : index
    %43 = vector.load %arg2[%c0_30, %c2_31, %c0_32, %c0_33] : memref<1x4x16x16xf32, #tpu.memory_space<vmem>>, vector<1x1x16x16xf32>
    %44 = vector.shape_cast %43 : vector<1x1x16x16xf32> to vector<16x16xf32>
    %45 = arith.truncf %44 : vector<16x16xf32> to vector<16x16xbf16>
    %cst_34 = arith.constant dense<0.000000e+00> : vector<32x16xf32>
    %46 = tpu.matmul %0, %45, %cst_34 {dimension_numbers = #tpu.dot_dimension_numbers<[1], [0], [0], [1], [0, 0, 1, 1], [], []>} : vector<32x16xbf16>, vector<16x16xbf16>, vector<32x16xf32> -> vector<32x16xf32>
    %47 = arith.truncf %46 : vector<32x16xf32> to vector<32x16xbf16>
    %48 = vector.extract_strided_slice %47 {offsets = [0, 0], sizes = [8, 16], strides = [1, 1]} : vector<32x16xbf16> to vector<8x16xbf16>
    %c0_35 = arith.constant 0 : index
    %c16 = arith.constant 16 : index
    %c0_36 = arith.constant 0 : index
    %49 = vector.load %arg6[%c0_35, %c16, %c0_36] : memref<4x32x16xbf16, #tpu.memory_space<vmem>>, vector<1x8x16xbf16>
    %50 = vector.shape_cast %49 : vector<1x8x16xbf16> to vector<8x16xbf16>
    %51 = vector.shape_cast %48 : vector<8x16xbf16> to vector<1x8x16xbf16>
    tpu.vector_store %arg6[%c0_35, %c16, %c0_36], %51 {strides = array<i32>} : memref<4x32x16xbf16, #tpu.memory_space<vmem>>, vector<1x8x16xbf16>,
    %52 = vector.extract_strided_slice %47 {offsets = [8, 0], sizes = [8, 16], strides = [1, 1]} : vector<32x16xbf16> to vector<8x16xbf16>
    %c1_37 = arith.constant 1 : index
    %c16_38 = arith.constant 16 : index
    %c0_39 = arith.constant 0 : index
    %53 = vector.load %arg6[%c1_37, %c16_38, %c0_39] : memref<4x32x16xbf16, #tpu.memory_space<vmem>>, vector<1x8x16xbf16>
    %54 = vector.shape_cast %53 : vector<1x8x16xbf16> to vector<8x16xbf16>
    %55 = vector.shape_cast %52 : vector<8x16xbf16> to vector<1x8x16xbf16>
    tpu.vector_store %arg6[%c1_37, %c16_38, %c0_39], %55 {strides = array<i32>} : memref<4x32x16xbf16, #tpu.memory_space<vmem>>, vector<1x8x16xbf16>,
    %56 = vector.extract_strided_slice %47 {offsets = [16, 0], sizes = [8, 16], strides = [1, 1]} : vector<32x16xbf16> to vector<8x16xbf16>
    %c2_40 = arith.constant 2 : index
    %c16_41 = arith.constant 16 : index
    %c0_42 = arith.constant 0 : index
    %57 = vector.load %arg6[%c2_40, %c16_41, %c0_42] : memref<4x32x16xbf16, #tpu.memory_space<vmem>>, vector<1x8x16xbf16>
    %58 = vector.shape_cast %57 : vector<1x8x16xbf16> to vector<8x16xbf16>
    %59 = vector.shape_cast %56 : vector<8x16xbf16> to vector<1x8x16xbf16>
    tpu.vector_store %arg6[%c2_40, %c16_41, %c0_42], %59 {strides = array<i32>} : memref<4x32x16xbf16, #tpu.memory_space<vmem>>, vector<1x8x16xbf16>,
    %60 = vector.extract_strided_slice %47 {offsets = [24, 0], sizes = [8, 16], strides = [1, 1]} : vector<32x16xbf16> to vector<8x16xbf16>
    %c3_43 = arith.constant 3 : index
    %c16_44 = arith.constant 16 : index
    %c0_45 = arith.constant 0 : index
    %61 = vector.load %arg6[%c3_43, %c16_44, %c0_45] : memref<4x32x16xbf16, #tpu.memory_space<vmem>>, vector<1x8x16xbf16>
    %62 = vector.shape_cast %61 : vector<1x8x16xbf16> to vector<8x16xbf16>
    %63 = vector.shape_cast %60 : vector<8x16xbf16> to vector<1x8x16xbf16>
    tpu.vector_store %arg6[%c3_43, %c16_44, %c0_45], %63 {strides = array<i32>} : memref<4x32x16xbf16, #tpu.memory_space<vmem>>, vector<1x8x16xbf16>,
    %c0_46 = arith.constant 0 : index
    %c3_47 = arith.constant 3 : index
    %c0_48 = arith.constant 0 : index
    %c0_49 = arith.constant 0 : index
    %64 = vector.load %arg2[%c0_46, %c3_47, %c0_48, %c0_49] : memref<1x4x16x16xf32, #tpu.memory_space<vmem>>, vector<1x1x16x16xf32>
    %65 = vector.shape_cast %64 : vector<1x1x16x16xf32> to vector<16x16xf32>
    %66 = arith.truncf %65 : vector<16x16xf32> to vector<16x16xbf16>
    %cst_50 = arith.constant dense<0.000000e+00> : vector<32x16xf32>
    %67 = tpu.matmul %0, %66, %cst_50 {dimension_numbers = #tpu.dot_dimension_numbers<[1], [0], [0], [1], [0, 0, 1, 1], [], []>} : vector<32x16xbf16>, vector<16x16xbf16>, vector<32x16xf32> -> vector<32x16xf32>
    %68 = arith.truncf %67 : vector<32x16xf32> to vector<32x16xbf16>
    %69 = vector.extract_strided_slice %68 {offsets = [0, 0], sizes = [8, 16], strides = [1, 1]} : vector<32x16xbf16> to vector<8x16xbf16>
    %c0_51 = arith.constant 0 : index
    %c24 = arith.constant 24 : index
    %c0_52 = arith.constant 0 : index
    %70 = vector.load %arg6[%c0_51, %c24, %c0_52] : memref<4x32x16xbf16, #tpu.memory_space<vmem>>, vector<1x8x16xbf16>
    %71 = vector.shape_cast %70 : vector<1x8x16xbf16> to vector<8x16xbf16>
    %72 = vector.shape_cast %69 : vector<8x16xbf16> to vector<1x8x16xbf16>
    tpu.vector_store %arg6[%c0_51, %c24, %c0_52], %72 {strides = array<i32>} : memref<4x32x16xbf16, #tpu.memory_space<vmem>>, vector<1x8x16xbf16>,
    %73 = vector.extract_strided_slice %68 {offsets = [8, 0], sizes = [8, 16], strides = [1, 1]} : vector<32x16xbf16> to vector<8x16xbf16>
    %c1_53 = arith.constant 1 : index
    %c24_54 = arith.constant 24 : index
    %c0_55 = arith.constant 0 : index
    %74 = vector.load %arg6[%c1_53, %c24_54, %c0_55] : memref<4x32x16xbf16, #tpu.memory_space<vmem>>, vector<1x8x16xbf16>
    %75 = vector.shape_cast %74 : vector<1x8x16xbf16> to vector<8x16xbf16>
    %76 = vector.shape_cast %73 : vector<8x16xbf16> to vector<1x8x16xbf16>
    tpu.vector_store %arg6[%c1_53, %c24_54, %c0_55], %76 {strides = array<i32>} : memref<4x32x16xbf16, #tpu.memory_space<vmem>>, vector<1x8x16xbf16>,
    %77 = vector.extract_strided_slice %68 {offsets = [16, 0], sizes = [8, 16], strides = [1, 1]} : vector<32x16xbf16> to vector<8x16xbf16>
    %c2_56 = arith.constant 2 : index
    %c24_57 = arith.constant 24 : index
    %c0_58 = arith.constant 0 : index
    %78 = vector.load %arg6[%c2_56, %c24_57, %c0_58] : memref<4x32x16xbf16, #tpu.memory_space<vmem>>, vector<1x8x16xbf16>
    %79 = vector.shape_cast %78 : vector<1x8x16xbf16> to vector<8x16xbf16>
    %80 = vector.shape_cast %77 : vector<8x16xbf16> to vector<1x8x16xbf16>
    tpu.vector_store %arg6[%c2_56, %c24_57, %c0_58], %80 {strides = array<i32>} : memref<4x32x16xbf16, #tpu.memory_space<vmem>>, vector<1x8x16xbf16>,
    %81 = vector.extract_strided_slice %68 {offsets = [24, 0], sizes = [8, 16], strides = [1, 1]} : vector<32x16xbf16> to vector<8x16xbf16>
    %c3_59 = arith.constant 3 : index
    %c24_60 = arith.constant 24 : index
    %c0_61 = arith.constant 0 : index
    %82 = vector.load %arg6[%c3_59, %c24_60, %c0_61] : memref<4x32x16xbf16, #tpu.memory_space<vmem>>, vector<1x8x16xbf16>
    %83 = vector.shape_cast %82 : vector<1x8x16xbf16> to vector<8x16xbf16>
    %84 = vector.shape_cast %81 : vector<8x16xbf16> to vector<1x8x16xbf16>
    tpu.vector_store %arg6[%c3_59, %c24_60, %c0_61], %84 {strides = array<i32>} : memref<4x32x16xbf16, #tpu.memory_space<vmem>>, vector<1x8x16xbf16>,
    %c0_62 = arith.constant 0 : index
    %c0_63 = arith.constant 0 : index
    %c0_64 = arith.constant 0 : index
    %85 = vector.load %arg6[%c0_62, %c0_63, %c0_64] : memref<4x32x16xbf16, #tpu.memory_space<vmem>>, vector<1x32x16xbf16>
    %86 = vector.shape_cast %85 : vector<1x32x16xbf16> to vector<32x16xbf16>
    %c0_65 = arith.constant 0 : index
    %c0_66 = arith.constant 0 : index
    %c0_67 = arith.constant 0 : index
    %87 = vector.load %arg4[%c0_65, %c0_66, %c0_67] : memref<4x16x128xbf16, #tpu.memory_space<vmem>>, vector<1x16x128xbf16>
    %88 = vector.shape_cast %87 : vector<1x16x128xbf16> to vector<16x128xbf16>
    %cst_68 = arith.constant dense<0.000000e+00> : vector<32x128xf32>
    %89 = tpu.matmul %86, %88, %cst_68 {dimension_numbers = #tpu.dot_dimension_numbers<[1], [0], [0], [1], [0, 0, 1, 1], [], []>} : vector<32x16xbf16>, vector<16x128xbf16>, vector<32x128xf32> -> vector<32x128xf32>
    %90 = vector.extract_strided_slice %89 {offsets = [0, 0], sizes = [8, 128], strides = [1, 1]} : vector<32x128xf32> to vector<8x128xf32>
    %c0_69 = arith.constant 0 : index
    %c0_70 = arith.constant 0 : index
    %c0_71 = arith.constant 0 : index
    %c0_72 = arith.constant 0 : index
    %c0_73 = arith.constant 0 : index
    %91 = vector.load %arg5[%c0_69, %c0_70, %c0_71, %c0_72, %c0_73] : memref<4x1x4x8x128xf32, #tpu.memory_space<vmem>>, vector<1x1x1x8x128xf32>
    %92 = vector.shape_cast %91 : vector<1x1x1x8x128xf32> to vector<8x128xf32>
    %93 = vector.shape_cast %90 : vector<8x128xf32> to vector<1x1x1x8x128xf32>
    tpu.vector_store %arg5[%c0_69, %c0_70, %c0_71, %c0_72, %c0_73], %93 {strides = array<i32>} : memref<4x1x4x8x128xf32, #tpu.memory_space<vmem>>, vector<1x1x1x8x128xf32>,
    %94 = vector.extract_strided_slice %89 {offsets = [8, 0], sizes = [8, 128], strides = [1, 1]} : vector<32x128xf32> to vector<8x128xf32>
    %c0_74 = arith.constant 0 : index
    %c0_75 = arith.constant 0 : index
    %c1_76 = arith.constant 1 : index
    %c0_77 = arith.constant 0 : index
    %c0_78 = arith.constant 0 : index
    %95 = vector.load %arg5[%c0_74, %c0_75, %c1_76, %c0_77, %c0_78] : memref<4x1x4x8x128xf32, #tpu.memory_space<vmem>>, vector<1x1x1x8x128xf32>
    %96 = vector.shape_cast %95 : vector<1x1x1x8x128xf32> to vector<8x128xf32>
    %97 = vector.shape_cast %94 : vector<8x128xf32> to vector<1x1x1x8x128xf32>
    tpu.vector_store %arg5[%c0_74, %c0_75, %c1_76, %c0_77, %c0_78], %97 {strides = array<i32>} : memref<4x1x4x8x128xf32, #tpu.memory_space<vmem>>, vector<1x1x1x8x128xf32>,
    %98 = vector.extract_strided_slice %89 {offsets = [16, 0], sizes = [8, 128], strides = [1, 1]} : vector<32x128xf32> to vector<8x128xf32>
    %c0_79 = arith.constant 0 : index
    %c0_80 = arith.constant 0 : index
    %c2_81 = arith.constant 2 : index
    %c0_82 = arith.constant 0 : index
    %c0_83 = arith.constant 0 : index
    %99 = vector.load %arg5[%c0_79, %c0_80, %c2_81, %c0_82, %c0_83] : memref<4x1x4x8x128xf32, #tpu.memory_space<vmem>>, vector<1x1x1x8x128xf32>
    %100 = vector.shape_cast %99 : vector<1x1x1x8x128xf32> to vector<8x128xf32>
    %101 = vector.shape_cast %98 : vector<8x128xf32> to vector<1x1x1x8x128xf32>
    tpu.vector_store %arg5[%c0_79, %c0_80, %c2_81, %c0_82, %c0_83], %101 {strides = array<i32>} : memref<4x1x4x8x128xf32, #tpu.memory_space<vmem>>, vector<1x1x1x8x128xf32>,
    %102 = vector.extract_strided_slice %89 {offsets = [24, 0], sizes = [8, 128], strides = [1, 1]} : vector<32x128xf32> to vector<8x128xf32>
    %c0_84 = arith.constant 0 : index
    %c0_85 = arith.constant 0 : index
    %c3_86 = arith.constant 3 : index
    %c0_87 = arith.constant 0 : index
    %c0_88 = arith.constant 0 : index
    %103 = vector.load %arg5[%c0_84, %c0_85, %c3_86, %c0_87, %c0_88] : memref<4x1x4x8x128xf32, #tpu.memory_space<vmem>>, vector<1x1x1x8x128xf32>
    %104 = vector.shape_cast %103 : vector<1x1x1x8x128xf32> to vector<8x128xf32>
    %105 = vector.shape_cast %102 : vector<8x128xf32> to vector<1x1x1x8x128xf32>
    tpu.vector_store %arg5[%c0_84, %c0_85, %c3_86, %c0_87, %c0_88], %105 {strides = array<i32>} : memref<4x1x4x8x128xf32, #tpu.memory_space<vmem>>, vector<1x1x1x8x128xf32>,
    %c1_89 = arith.constant 1 : index
    %c0_90 = arith.constant 0 : index
    %c0_91 = arith.constant 0 : index
    %106 = vector.load %arg6[%c1_89, %c0_90, %c0_91] : memref<4x32x16xbf16, #tpu.memory_space<vmem>>, vector<1x32x16xbf16>
    %107 = vector.shape_cast %106 : vector<1x32x16xbf16> to vector<32x16xbf16>
    %c1_92 = arith.constant 1 : index
    %c0_93 = arith.constant 0 : index
    %c0_94 = arith.constant 0 : index
    %108 = vector.load %arg4[%c1_92, %c0_93, %c0_94] : memref<4x16x128xbf16, #tpu.memory_space<vmem>>, vector<1x16x128xbf16>
    %109 = vector.shape_cast %108 : vector<1x16x128xbf16> to vector<16x128xbf16>
    %cst_95 = arith.constant dense<0.000000e+00> : vector<32x128xf32>
    %110 = tpu.matmul %107, %109, %cst_95 {dimension_numbers = #tpu.dot_dimension_numbers<[1], [0], [0], [1], [0, 0, 1, 1], [], []>} : vector<32x16xbf16>, vector<16x128xbf16>, vector<32x128xf32> -> vector<32x128xf32>
    %111 = vector.extract_strided_slice %110 {offsets = [0, 0], sizes = [8, 128], strides = [1, 1]} : vector<32x128xf32> to vector<8x128xf32>
    %c1_96 = arith.constant 1 : index
    %c0_97 = arith.constant 0 : index
    %c0_98 = arith.constant 0 : index
    %c0_99 = arith.constant 0 : index
    %c0_100 = arith.constant 0 : index
    %112 = vector.load %arg5[%c1_96, %c0_97, %c0_98, %c0_99, %c0_100] : memref<4x1x4x8x128xf32, #tpu.memory_space<vmem>>, vector<1x1x1x8x128xf32>
    %113 = vector.shape_cast %112 : vector<1x1x1x8x128xf32> to vector<8x128xf32>
    %114 = vector.shape_cast %111 : vector<8x128xf32> to vector<1x1x1x8x128xf32>
    tpu.vector_store %arg5[%c1_96, %c0_97, %c0_98, %c0_99, %c0_100], %114 {strides = array<i32>} : memref<4x1x4x8x128xf32, #tpu.memory_space<vmem>>, vector<1x1x1x8x128xf32>,
    %115 = vector.extract_strided_slice %110 {offsets = [8, 0], sizes = [8, 128], strides = [1, 1]} : vector<32x128xf32> to vector<8x128xf32>
    %c1_101 = arith.constant 1 : index
    %c0_102 = arith.constant 0 : index
    %c1_103 = arith.constant 1 : index
    %c0_104 = arith.constant 0 : index
    %c0_105 = arith.constant 0 : index
    %116 = vector.load %arg5[%c1_101, %c0_102, %c1_103, %c0_104, %c0_105] : memref<4x1x4x8x128xf32, #tpu.memory_space<vmem>>, vector<1x1x1x8x128xf32>
    %117 = vector.shape_cast %116 : vector<1x1x1x8x128xf32> to vector<8x128xf32>
    %118 = vector.shape_cast %115 : vector<8x128xf32> to vector<1x1x1x8x128xf32>
    tpu.vector_store %arg5[%c1_101, %c0_102, %c1_103, %c0_104, %c0_105], %118 {strides = array<i32>} : memref<4x1x4x8x128xf32, #tpu.memory_space<vmem>>, vector<1x1x1x8x128xf32>,
    %119 = vector.extract_strided_slice %110 {offsets = [16, 0], sizes = [8, 128], strides = [1, 1]} : vector<32x128xf32> to vector<8x128xf32>
    %c1_106 = arith.constant 1 : index
    %c0_107 = arith.constant 0 : index
    %c2_108 = arith.constant 2 : index
    %c0_109 = arith.constant 0 : index
    %c0_110 = arith.constant 0 : index
    %120 = vector.load %arg5[%c1_106, %c0_107, %c2_108, %c0_109, %c0_110] : memref<4x1x4x8x128xf32, #tpu.memory_space<vmem>>, vector<1x1x1x8x128xf32>
    %121 = vector.shape_cast %120 : vector<1x1x1x8x128xf32> to vector<8x128xf32>
    %122 = vector.shape_cast %119 : vector<8x128xf32> to vector<1x1x1x8x128xf32>
    tpu.vector_store %arg5[%c1_106, %c0_107, %c2_108, %c0_109, %c0_110], %122 {strides = array<i32>} : memref<4x1x4x8x128xf32, #tpu.memory_space<vmem>>, vector<1x1x1x8x128xf32>,
    %123 = vector.extract_strided_slice %110 {offsets = [24, 0], sizes = [8, 128], strides = [1, 1]} : vector<32x128xf32> to vector<8x128xf32>
    %c1_111 = arith.constant 1 : index
    %c0_112 = arith.constant 0 : index
    %c3_113 = arith.constant 3 : index
    %c0_114 = arith.constant 0 : index
    %c0_115 = arith.constant 0 : index
    %124 = vector.load %arg5[%c1_111, %c0_112, %c3_113, %c0_114, %c0_115] : memref<4x1x4x8x128xf32, #tpu.memory_space<vmem>>, vector<1x1x1x8x128xf32>
    %125 = vector.shape_cast %124 : vector<1x1x1x8x128xf32> to vector<8x128xf32>
    %126 = vector.shape_cast %123 : vector<8x128xf32> to vector<1x1x1x8x128xf32>
    tpu.vector_store %arg5[%c1_111, %c0_112, %c3_113, %c0_114, %c0_115], %126 {strides = array<i32>} : memref<4x1x4x8x128xf32, #tpu.memory_space<vmem>>, vector<1x1x1x8x128xf32>,
    %c2_116 = arith.constant 2 : index
    %c0_117 = arith.constant 0 : index
    %c0_118 = arith.constant 0 : index
    %127 = vector.load %arg6[%c2_116, %c0_117, %c0_118] : memref<4x32x16xbf16, #tpu.memory_space<vmem>>, vector<1x32x16xbf16>
    %128 = vector.shape_cast %127 : vector<1x32x16xbf16> to vector<32x16xbf16>
    %c2_119 = arith.constant 2 : index
    %c0_120 = arith.constant 0 : index
    %c0_121 = arith.constant 0 : index
    %129 = vector.load %arg4[%c2_119, %c0_120, %c0_121] : memref<4x16x128xbf16, #tpu.memory_space<vmem>>, vector<1x16x128xbf16>
    %130 = vector.shape_cast %129 : vector<1x16x128xbf16> to vector<16x128xbf16>
    %cst_122 = arith.constant dense<0.000000e+00> : vector<32x128xf32>
    %131 = tpu.matmul %128, %130, %cst_122 {dimension_numbers = #tpu.dot_dimension_numbers<[1], [0], [0], [1], [0, 0, 1, 1], [], []>} : vector<32x16xbf16>, vector<16x128xbf16>, vector<32x128xf32> -> vector<32x128xf32>
    %132 = vector.extract_strided_slice %131 {offsets = [0, 0], sizes = [8, 128], strides = [1, 1]} : vector<32x128xf32> to vector<8x128xf32>
    %c2_123 = arith.constant 2 : index
    %c0_124 = arith.constant 0 : index
    %c0_125 = arith.constant 0 : index
    %c0_126 = arith.constant 0 : index
    %c0_127 = arith.constant 0 : index
    %133 = vector.load %arg5[%c2_123, %c0_124, %c0_125, %c0_126, %c0_127] : memref<4x1x4x8x128xf32, #tpu.memory_space<vmem>>, vector<1x1x1x8x128xf32>
    %134 = vector.shape_cast %133 : vector<1x1x1x8x128xf32> to vector<8x128xf32>
    %135 = vector.shape_cast %132 : vector<8x128xf32> to vector<1x1x1x8x128xf32>
    tpu.vector_store %arg5[%c2_123, %c0_124, %c0_125, %c0_126, %c0_127], %135 {strides = array<i32>} : memref<4x1x4x8x128xf32, #tpu.memory_space<vmem>>, vector<1x1x1x8x128xf32>,
    %136 = vector.extract_strided_slice %131 {offsets = [8, 0], sizes = [8, 128], strides = [1, 1]} : vector<32x128xf32> to vector<8x128xf32>
    %c2_128 = arith.constant 2 : index
    %c0_129 = arith.constant 0 : index
    %c1_130 = arith.constant 1 : index
    %c0_131 = arith.constant 0 : index
    %c0_132 = arith.constant 0 : index
    %137 = vector.load %arg5[%c2_128, %c0_129, %c1_130, %c0_131, %c0_132] : memref<4x1x4x8x128xf32, #tpu.memory_space<vmem>>, vector<1x1x1x8x128xf32>
    %138 = vector.shape_cast %137 : vector<1x1x1x8x128xf32> to vector<8x128xf32>
    %139 = vector.shape_cast %136 : vector<8x128xf32> to vector<1x1x1x8x128xf32>
    tpu.vector_store %arg5[%c2_128, %c0_129, %c1_130, %c0_131, %c0_132], %139 {strides = array<i32>} : memref<4x1x4x8x128xf32, #tpu.memory_space<vmem>>, vector<1x1x1x8x128xf32>,
    %140 = vector.extract_strided_slice %131 {offsets = [16, 0], sizes = [8, 128], strides = [1, 1]} : vector<32x128xf32> to vector<8x128xf32>
    %c2_133 = arith.constant 2 : index
    %c0_134 = arith.constant 0 : index
    %c2_135 = arith.constant 2 : index
    %c0_136 = arith.constant 0 : index
    %c0_137 = arith.constant 0 : index
    %141 = vector.load %arg5[%c2_133, %c0_134, %c2_135, %c0_136, %c0_137] : memref<4x1x4x8x128xf32, #tpu.memory_space<vmem>>, vector<1x1x1x8x128xf32>
    %142 = vector.shape_cast %141 : vector<1x1x1x8x128xf32> to vector<8x128xf32>
    %143 = vector.shape_cast %140 : vector<8x128xf32> to vector<1x1x1x8x128xf32>
    tpu.vector_store %arg5[%c2_133, %c0_134, %c2_135, %c0_136, %c0_137], %143 {strides = array<i32>} : memref<4x1x4x8x128xf32, #tpu.memory_space<vmem>>, vector<1x1x1x8x128xf32>,
    %144 = vector.extract_strided_slice %131 {offsets = [24, 0], sizes = [8, 128], strides = [1, 1]} : vector<32x128xf32> to vector<8x128xf32>
    %c2_138 = arith.constant 2 : index
    %c0_139 = arith.constant 0 : index
    %c3_140 = arith.constant 3 : index
    %c0_141 = arith.constant 0 : index
    %c0_142 = arith.constant 0 : index
    %145 = vector.load %arg5[%c2_138, %c0_139, %c3_140, %c0_141, %c0_142] : memref<4x1x4x8x128xf32, #tpu.memory_space<vmem>>, vector<1x1x1x8x128xf32>
    %146 = vector.shape_cast %145 : vector<1x1x1x8x128xf32> to vector<8x128xf32>
    %147 = vector.shape_cast %144 : vector<8x128xf32> to vector<1x1x1x8x128xf32>
    tpu.vector_store %arg5[%c2_138, %c0_139, %c3_140, %c0_141, %c0_142], %147 {strides = array<i32>} : memref<4x1x4x8x128xf32, #tpu.memory_space<vmem>>, vector<1x1x1x8x128xf32>,
    %c3_143 = arith.constant 3 : index
    %c0_144 = arith.constant 0 : index
    %c0_145 = arith.constant 0 : index
    %148 = vector.load %arg6[%c3_143, %c0_144, %c0_145] : memref<4x32x16xbf16, #tpu.memory_space<vmem>>, vector<1x32x16xbf16>
    %149 = vector.shape_cast %148 : vector<1x32x16xbf16> to vector<32x16xbf16>
    %c3_146 = arith.constant 3 : index
    %c0_147 = arith.constant 0 : index
    %c0_148 = arith.constant 0 : index
    %150 = vector.load %arg4[%c3_146, %c0_147, %c0_148] : memref<4x16x128xbf16, #tpu.memory_space<vmem>>, vector<1x16x128xbf16>
    %151 = vector.shape_cast %150 : vector<1x16x128xbf16> to vector<16x128xbf16>
    %cst_149 = arith.constant dense<0.000000e+00> : vector<32x128xf32>
    %152 = tpu.matmul %149, %151, %cst_149 {dimension_numbers = #tpu.dot_dimension_numbers<[1], [0], [0], [1], [0, 0, 1, 1], [], []>} : vector<32x16xbf16>, vector<16x128xbf16>, vector<32x128xf32> -> vector<32x128xf32>
    %153 = vector.extract_strided_slice %152 {offsets = [0, 0], sizes = [8, 128], strides = [1, 1]} : vector<32x128xf32> to vector<8x128xf32>
    %c3_150 = arith.constant 3 : index
    %c0_151 = arith.constant 0 : index
    %c0_152 = arith.constant 0 : index
    %c0_153 = arith.constant 0 : index
    %c0_154 = arith.constant 0 : index
    %154 = vector.load %arg5[%c3_150, %c0_151, %c0_152, %c0_153, %c0_154] : memref<4x1x4x8x128xf32, #tpu.memory_space<vmem>>, vector<1x1x1x8x128xf32>
    %155 = vector.shape_cast %154 : vector<1x1x1x8x128xf32> to vector<8x128xf32>
    %156 = vector.shape_cast %153 : vector<8x128xf32> to vector<1x1x1x8x128xf32>
    tpu.vector_store %arg5[%c3_150, %c0_151, %c0_152, %c0_153, %c0_154], %156 {strides = array<i32>} : memref<4x1x4x8x128xf32, #tpu.memory_space<vmem>>, vector<1x1x1x8x128xf32>,
    %157 = vector.extract_strided_slice %152 {offsets = [8, 0], sizes = [8, 128], strides = [1, 1]} : vector<32x128xf32> to vector<8x128xf32>
    %c3_155 = arith.constant 3 : index
    %c0_156 = arith.constant 0 : index
    %c1_157 = arith.constant 1 : index
    %c0_158 = arith.constant 0 : index
    %c0_159 = arith.constant 0 : index
    %158 = vector.load %arg5[%c3_155, %c0_156, %c1_157, %c0_158, %c0_159] : memref<4x1x4x8x128xf32, #tpu.memory_space<vmem>>, vector<1x1x1x8x128xf32>
    %159 = vector.shape_cast %158 : vector<1x1x1x8x128xf32> to vector<8x128xf32>
    %160 = vector.shape_cast %157 : vector<8x128xf32> to vector<1x1x1x8x128xf32>
    tpu.vector_store %arg5[%c3_155, %c0_156, %c1_157, %c0_158, %c0_159], %160 {strides = array<i32>} : memref<4x1x4x8x128xf32, #tpu.memory_space<vmem>>, vector<1x1x1x8x128xf32>,
    %161 = vector.extract_strided_slice %152 {offsets = [16, 0], sizes = [8, 128], strides = [1, 1]} : vector<32x128xf32> to vector<8x128xf32>
    %c3_160 = arith.constant 3 : index
    %c0_161 = arith.constant 0 : index
    %c2_162 = arith.constant 2 : index
    %c0_163 = arith.constant 0 : index
    %c0_164 = arith.constant 0 : index
    %162 = vector.load %arg5[%c3_160, %c0_161, %c2_162, %c0_163, %c0_164] : memref<4x1x4x8x128xf32, #tpu.memory_space<vmem>>, vector<1x1x1x8x128xf32>
    %163 = vector.shape_cast %162 : vector<1x1x1x8x128xf32> to vector<8x128xf32>
    %164 = vector.shape_cast %161 : vector<8x128xf32> to vector<1x1x1x8x128xf32>
    tpu.vector_store %arg5[%c3_160, %c0_161, %c2_162, %c0_163, %c0_164], %164 {strides = array<i32>} : memref<4x1x4x8x128xf32, #tpu.memory_space<vmem>>, vector<1x1x1x8x128xf32>,
    %165 = vector.extract_strided_slice %152 {offsets = [24, 0], sizes = [8, 128], strides = [1, 1]} : vector<32x128xf32> to vector<8x128xf32>
    %c3_165 = arith.constant 3 : index
    %c0_166 = arith.constant 0 : index
    %c3_167 = arith.constant 3 : index
    %c0_168 = arith.constant 0 : index
    %c0_169 = arith.constant 0 : index
    %166 = vector.load %arg5[%c3_165, %c0_166, %c3_167, %c0_168, %c0_169] : memref<4x1x4x8x128xf32, #tpu.memory_space<vmem>>, vector<1x1x1x8x128xf32>
    %167 = vector.shape_cast %166 : vector<1x1x1x8x128xf32> to vector<8x128xf32>
    %168 = vector.shape_cast %165 : vector<8x128xf32> to vector<1x1x1x8x128xf32>
    tpu.vector_store %arg5[%c3_165, %c0_166, %c3_167, %c0_168, %c0_169], %168 {strides = array<i32>} : memref<4x1x4x8x128xf32, #tpu.memory_space<vmem>>, vector<1x1x1x8x128xf32>,
    return
  }
  func.func @transform_0(%arg0: i32, %arg1: i32) -> (i32, i32, i32, i32) {
    %c0_i32 = arith.constant 0 : i32
    %c0_i32_0 = arith.constant 0 : i32
    %c0_i32_1 = arith.constant 0 : i32
    return %arg0, %arg1, %c0_i32, %c0_i32_0 : i32, i32, i32, i32
  }
  func.func @transform_1(%arg0: i32, %arg1: i32) -> (i32, i32) {
    %c0_i32 = arith.constant 0 : i32
    %c0_i32_0 = arith.constant 0 : i32
    %c0_i32_1 = arith.constant 0 : i32
    return %c0_i32, %c0_i32_0 : i32, i32
  }
  func.func @transform_2(%arg0: i32, %arg1: i32) -> (i32, i32, i32) {
    %c0_i32 = arith.constant 0 : i32
    %c0_i32_0 = arith.constant 0 : i32
    %c0_i32_1 = arith.constant 0 : i32
    %c0_i32_2 = arith.constant 0 : i32
    return %c0_i32, %c0_i32_0, %c0_i32_1 : i32, i32, i32
  }
  func.func @transform_3(%arg0: i32, %arg1: i32) -> (i32, i32, i32, i32, i32) {
    %c0_i32 = arith.constant 0 : i32
    %c0_i32_0 = arith.constant 0 : i32
    %c0_i32_1 = arith.constant 0 : i32
    %c0_i32_2 = arith.constant 0 : i32
    return %c0_i32, %arg0, %arg1, %c0_i32_0, %c0_i32_1 : i32, i32, i32, i32, i32
  }
}

</mosaic_0001>

<bundles_post_ra>
// kernel: tpu_custom_call.1
= control target key start
LH: loop header
LB: loop body
LE: loop exit
PB: predicated region body
PF: predicated region fallthrough
CT: control target
= control target key end

     0   :  { %8 = vsyncpa [#allocation4], 0  ;;  %s1596_s0 = inlined_call_operand.hbm [shape: f32[2,4,16,16], index: 0, kind: input, shape index: {}]   ;;  %s1597_s1 = inlined_call_operand.vmem [shape: bf16[32,16], index: 1, kind: input, shape index: {}]   ;;  %s1598_s2 = inlined_call_operand.hbm [shape: bf16[4,16,128], index: 2, kind: input, shape index: {}]   ;;  %s1599_s3 = inlined_call_operand.hbm [shape: f32[4,2,4,8,128], index: 3, kind: output, shape index: {}]  }
   0x1   :  { %10 = vsyncpa [#allocation4 + $0x1], 0 }
   0x2   :  { %11 = vsyncpa [#allocation7], 0 }
   0x3   :  { %12 = vsyncpa [#allocation5], 0 }
   0x4   :  { %14 = vsyncpa [#allocation5 + $0x1], 0  ;;  %s1328_s12 = smov 0   ;;  %s1330_s13 = smov 0  }
   0x5   :  { %s1332_s14 = smov 0   ;;  %s1334_s15 = smov 0  }
   0x6   :  { %s1336_s16 = smov 0   ;;  %s1338_s17 = smov 0  }
   0x7 LB: > { %s947_s18 = sadd.s32 4294967295, %s1293_s17   ;;  %s948_s19 = sadd.s32 4294967294, %s1293_s17   ;;  %s1293_s17 = sphi %s1338_s17, %s20_s17   ;;  %s1289_s16 = sphi %s1336_s16, %s1623_s16   ;;  %s1285_s15 = sphi %s1334_s15, %s1622_s15   ;;  %s1281_s14 = sphi %s1332_s14, %s1621_s14   ;;  %s1277_s13 = sphi %s1330_s13, %s1620_s13   ;;  %s1273_s12 = sphi %s1328_s12, %s1619_s12  }
   0x8   : > { %p54_p0 = scmp.ne.s32.totalorder %s1277_s13, %s1273_s12  ;;  %p1362_p1 = scmp.eq.s32.totalorder %s947_s18, 0 }
   0x9   : > { %p1366_p2 = scmp.eq.s32.totalorder %s947_s18, 1  ;;  %p128_p3 = scmp.eq.s32.totalorder %s948_s19, 1 }
   0xa   : > { %s1604_s20 = scalar_select %p1362_p1, 1, 0 }
   0xb   : > { %s1605_s21 = scalar_select %p1366_p2, 1, 0 }
   0xc   : > { %p1372_p4 = por %p1362_p1, %p54_p0  ;;  %p949_p5 = scmp.ge.s32.totalorder %s1293_s17, 1 }
   0xd   : > { %p1377_p6 = por %p128_p3, %p54_p0  ;;  %p135_p7 = scmp.lt.s32.totalorder %s1293_s17, 3 }
   0xe   : > { %s1606_s22 = scalar_select %p1372_p4, 1, 0 }
   0xf   : > { %s1607_s23 = scalar_select %p1377_p6, 1, 0 }
  0x10   : > { %p1382_p8 = pnand %p949_p5, %p135_p7  ;;  %s1295_s25 = smov [#allocation6]  }
  0x11   : > { %s150_s26 = sshll.u32 %s1295_s25, 4  ;;  %s32_s28 = sadd.s32 1, %s1289_s16  ;;  %s151_s26 = int_to_ptr.vmem [resolvable:$true] %s150_s26 }
  0x12   : > { %s1608_s24 = scalar_select %p1382_p8, 1, 0 }
  0x13   : > { %p1095_p9 = pneg %p1382_p8  ;;  %s1177_s4 = scalar_lea.hbm %s1598_s2, 512 }
  0x14   : > { %p1178_p12 = scmp.ne.s32.totalorder %s1598_s2, %s1177_s4  ;;  %p1184_p5 = scmp.lt.u32.totalorder %s1177_s4, %s1598_s2 }
  0x15   : > { %p1391_p11 = pnand %p1095_p9, %p1362_p1 }
  0x17   : > { %p1179_p13 = pneg %p1391_p11 }
  0x19   : > { %p1180_p0 = pnand %p1179_p13, %p1178_p12 }
  0x1b   : > { %p1181_p3 = pneg %p1180_p0 }
  0x1d   : > { %p1186_p7 = pnand %p1184_p5, %p1181_p3 }
  0x1f   : > { %1189 = shalt.err (!%p1186_p7)
}
  0x20   : > { %s1190_s9 = scalar_lea.vmem %s151_s26, 512  ;;  %p1198_p1 = scmp.lt.s32.totalorder %s151_s26, %s151_s26 }
  0x21   : > { %p1191_p9 = scmp.ne.s32.totalorder %s151_s26, %s1190_s9  ;;  %p1199_p4 = scmp.lt.s32.totalorder %s1190_s9, %s1190_s9 }
  0x23   : > { %p1193_p10 = pnand %p1191_p9, %p1179_p13  ;;  %p1200_p8 = por %p1199_p4, %p1198_p1 }
  0x25   : > { %p1194_p6 = pneg %p1193_p10 }
  0x27   : > { %p1201_p2 = pnand %p1200_p8, %p1194_p6 }
  0x29   : > { %1204 = shalt.err (!%p1201_p2)
}
  0x2a   : > { %s1296_s10 = smov 64   ;;  %s1297_s11 = smov 4  }
  0x2b   : > { %1098 = dma.hbm_to_vmem [thread:$0]  (!%p1391_p11), %s1598_s2, 512, %s151_s26, [#allocation7], %s1296_s10, %s1296_s10, %s1297_s11  }
  0x2c   : > { %p34_p1 = scmp.ge.s32.totalorder %s32_s28, 2  ;;  %s41_s25 = sadd.s32 1, %s1281_s14 }
  0x2d   : > { %p48_p2 = scmp.ne.s32.totalorder %s1281_s14, %s1277_s13  ;;  %p49_p4 = scmp.eq.s32.totalorder %s1293_s17, 0 }
  0x2e   : > { %s1625_s28 = smov (%p34_p1, %s32_s28), 0  ;;  %p1611_p8 = scmp.ne.s32.totalorder %s1605_s21, 0 }
  0x2f   : > { %p1418_p6 = por %p49_p4, %p48_p2  ;;  %s36_s27 = ssub.s32 %s1289_s16, %s1625_s28 }
  0x30   : > { %p1424_p10 = por %p1611_p8, %p48_p2  ;;  %p1108_p12 = scmp.lt.s32.totalorder %s1293_s17, 2 }
  0x31   : > { %p39_p11 = scmp.eq.s32.totalorder %s36_s27, 0  ;;  %s164_s26 = sand.u32 1, %s1281_s14  }
  0x32   : > { %s952_s4 = sshll.u32 %s164_s26, 6  ;;  %s1007_s6 = sshll.u32 %s1289_s16, 10 }
  0x33   : > { %s1433_s5 = scalar_select %p39_p11, %s1281_s14, %s41_s25  }
  0x34   : > { %s1439_s9 = scalar_lea.hbm %s1596_s0, %s1007_s6  ;;  %s168_s21 = scalar_lea.vmem [#allocation3], %s952_s4 }
  0x35   : > { %s178_s10 = sshll.u32 %s168_s21, 4  ;;  %p1445_p13 = pnand %p1108_p12, %p1418_p6  ;;  %s1441_s10 = int_to_ptr.vmem [resolvable:$true] %s178_s10 }
  0x36   : > { %s1449_s18 = scalar_lea.sflag [#allocation4], %s164_s26  ;;  %s1205_s19 = scalar_lea.hbm %s1439_s9, 1024 }
  0x37   : > { %p1206_p0 = scmp.ne.s32.totalorder %s1439_s9, %s1205_s19  ;;  %p1207_p3 = pneg %p1445_p13 }
  0x38   : > { %s1210_s29 = scalar_lea.hbm %s1596_s0, 2048  ;;  %p1211_p9 = scmp.lt.u32.totalorder %s1439_s9, %s1596_s0 }
  0x39   : > { %p1208_p5 = pnand %p1207_p3, %p1206_p0  ;;  %p1212_p1 = scmp.lt.u32.totalorder %s1210_s29, %s1205_s19 }
  0x3a   : > { %p1214_p4 = scmp.lt.u32.totalorder %s1205_s19, %s1439_s9 }
  0x3b   : > { %p1209_p7 = pneg %p1208_p5  ;;  %p1213_p2 = por %p1212_p1, %p1211_p9 }
  0x3d   : > { %p1215_p6 = por %p1214_p4, %p1213_p2 }
  0x3f   : > { %p1216_p8 = pnand %p1215_p6, %p1209_p7 }
  0x41   : > { %1219 = shalt.err (!%p1216_p8)
}
  0x42   : > { %s1220_s26 = scalar_lea.vmem %s1441_s10, 1024  ;;  %s1298_s7 = smov [#allocation3]  }
  0x43   : > { %p1221_p12 = scmp.ne.s32.totalorder %s1441_s10, %s1220_s26  ;;  %s1225_s8 = sshll.u32 %s1298_s7, 4  ;;  %s1226_s8 = int_to_ptr.vmem [resolvable:$false] %s1225_s8 }
  0x44   : > { %s1227_s21 = scalar_lea.vmem %s1226_s8, 2048  ;;  %p1228_p5 = scmp.lt.s32.totalorder %s1441_s10, %s1226_s8 }
  0x45   : > { %p1223_p11 = pnand %p1221_p12, %p1207_p3  ;;  %p1229_p9 = scmp.lt.s32.totalorder %s1227_s21, %s1220_s26 }
  0x47   : > { %p1224_p0 = pneg %p1223_p11  ;;  %p1230_p1 = por %p1229_p9, %p1228_p5 }
  0x49   : > { %p1231_p2 = pnand %p1230_p1, %p1224_p0 }
  0x4b   : > { %1234 = shalt.err (!%p1231_p2)
}
  0x4c   : > { %s1299_s19 = smov 128   ;;  %s1300_s25 = smov 8  }
  0x4d   : > { %1102 = dma.hbm_to_vmem [thread:$0]  (!%p1445_p13), %s1439_s9, 1024, %s1441_s10, %s1449_s18, %s1299_s19, %s1299_s19, %s1300_s25  }
  0x4e   : > { %p1614_p3 = scmp.ne.s32.totalorder %s1608_s24, 0 }
  0x4f   : > { %s1480_s27 = sand.u32 (!%p1614_p3), 1, %s1277_s13   ;;  %p1615_p7 = scmp.ne.s32.totalorder (!%p1614_p3), %s1606_s22, 0 }
  0x50   : > { %190 = sbr.rel (%p1614_p3) target bundleno = 568 (0x238), region = 32  ;;  %s956_s29 = sshll.u32 (!%p1614_p3), %s1480_s27, 6 }
  0x51   : > { %s193_s4 = scalar_lea.sflag (!%p1614_p3), [#allocation4], %s1480_s27  ;;  %s196_s6 = scalar_lea.vmem (!%p1614_p3), [#allocation3], %s956_s29 }
  0x57   : > { %1260 = dma.done.wait (%p1615_p7), %s193_s4, 1024  }
  0x58   : > { %1262 = vsyncadd (%p1615_p7), %s193_s4, 4294966272  ;;  %p1616_p4 = scmp.ne.s32.totalorder %s1604_s20, 0 }
  0x5a   : > { %1264 = dma.done.wait (%p1616_p4), [#allocation7], 512  }
  0x5b   : > { %1266 = vsyncadd (%p1616_p4), [#allocation7], 4294966784  ;;  %v230_v0 = vld [vmem:[%s196_s6] sm:$0xff]  ;;  %v231_v1 = vld [vmem:[%s196_s6 + $0x8] sm:$0xff]  ;;  %vm243_vm0 = vcmask 130048   ;;  %vm301_vm1 = vcmask 125952  }
  0x5c   : > { %v963_v2 = vld [vmem:[%s196_s6 + $0x10] sm:$0xff]  ;;  %v232_v3 = vpack.c.bf16 %v231_v1, %v230_v0  ;;  %v964_v4 = vld [vmem:[%s196_s6 + $0x18] sm:$0xff]  ;;  %v1171_v6 = vld [vmem:[%s1597_s1] sm:$0xff]   ;;  %vm373_vm2 = vcmask 130052   ;;  %s958_s20 = sshll.u32 %s1480_s27, 7  ;;  %s806_s18 = scalar_lea.sflag [#allocation5], %s1480_s27 }
  0x5d   : > { %v318_v5 = vpack.c.bf16 %v964_v4, %v963_v2  ;;  %v1172_v7 = vld [vmem:[%s1597_s1 + $0x8] sm:$0xff]   ;;  %v967_v8 = vld [vmem:[%s196_s6 + $0x20] sm:$0xff]  ;;  %v971_v11 = vld [vmem:[%s196_s6 + $0x30] sm:$0xff]  ;;  %1035 = vmatprep.mubr.msk.bf16.mxu0 %vm243_vm0, %v1171_v6  ;;  %1041 = vmatprep.mubr.msk.bf16.mxu1 %vm243_vm0, %v1171_v6  ;;  %s1535_s11 = scalar_lea.vmem [#allocation8], %s958_s20 }
  0x5e   : > { %1033 = vmatprep.subr.bf16.mxu0 %v232_v3  ;;  %v968_v9 = vld [vmem:[%s196_s6 + $0x28] sm:$0xff]  ;;  %v972_v12 = vld [vmem:[%s196_s6 + $0x38] sm:$0xff]  ;;  %v1173_v14 = vld [vmem:[#allocation6] sm:$0xff]  }
  0x5f   : > { %1039 = vmatprep.subr.bf16.mxu1 %v318_v5  ;;  %1034 = vmatpush3.bf16.msra.mxu0 %v232_v3  ;;  %v384_v10 = vpack.c.bf16 %v968_v9, %v967_v8  ;;  %v449_v13 = vpack.c.bf16 %v972_v12, %v971_v11  ;;  %v1174_v15 = vld [vmem:[#allocation6 + $0x8] sm:$0xff]   ;;  %v1506_v16 = vld [vmem:[#allocation6 + $0x10] sm:$0xff]   ;;  %v1176_v17 = vld [vmem:[#allocation6 + $0x18] sm:$0xff]  }
  0x60   : > { %1040 = vmatpush3.bf16.msra.mxu1 %v318_v5 }
  0x61   : > { %1045 = vmatprep.subr.bf16.mxu0 %v384_v10  ;;  %1051 = vmatprep.subr.bf16.mxu1 %v449_v13 }
  0x62   : > { %1036 = vmatmul.mubr.msk.bf16.vlgmr.msra.gmra.mrb[0].mxu0 %vm243_vm0, %v1172_v7 }
  0x63   : > { %1042 = vmatmul.mubr.msk.bf16.vlgmr.msra.gmra.mrb[0].mxu1 %vm243_vm0, %v1172_v7  ;;  %1046 = vmatpush3.bf16.msra.mxu0 %v384_v10 }
  0x64   : > { %1052 = vmatpush3.bf16.msra.mxu1 %v449_v13  ;;  %1047 = vmatprep.mubr.msk.bf16.mxu0 %vm243_vm0, %v1171_v6 }
  0x65   : > { %1053 = vmatprep.mubr.msk.bf16.mxu1 %vm243_vm0, %v1171_v6  ;;  %1057 = vmatprep.subr.bf16.mxu0 %v1173_v14 }
  0x66   : > { %1063 = vmatprep.subr.bf16.mxu1 %v1174_v15 }
  0x6a   : > { %1048 = vmatmul.mubr.msk.bf16.vlgmr.msra.gmra.mrb[4].mxu0 %vm243_vm0, %v1172_v7 }
  0x6b   : > { %1054 = vmatmul.mubr.msk.bf16.vlgmr.msra.gmra.mrb[4].mxu1 %vm243_vm0, %v1172_v7  ;;  %1058 = vmatpush3.bf16.msra.mxu0 %v1173_v14 }
  0x6c   : > { %1064 = vmatpush3.bf16.msra.mxu1 %v1174_v15  ;;  %1069 = vmatprep.subr.bf16.mxu0 %v1506_v16 }
  0x6d   : > { %1075 = vmatprep.subr.bf16.mxu1 %v1176_v17 }
 0x135   : > { %v1037_v18 = vpop.f32.mrb[0].mxu0 }
 0x136   : > { %v1043_v19 = vpop.f32.mrb[0].mxu1  ;;  %v284_v20 = vpop.f32.mrb[1].mxu0 }
 0x137   : > { %v353_v21 = vpop.f32.mrb[1].mxu1  ;;  %v1038_v22 = vpop.f32.mrb[2].mxu0 }
 0x138   : > { %v300_v23 = vpack.c.bf16 %v1038_v22, %v1037_v18  ;;  %v1044_v24 = vpop.f32.mrb[2].mxu1  ;;  %v287_v25 = vpop.f32.mrb[3].mxu0 }
 0x139   : > { %v369_v26 = vpack.c.bf16 %v1044_v24, %v1043_v19  ;;  %v299_v27 = vpack.c.bf16 %v287_v25, %v284_v20  ;;  %v356_v28 = vpop.f32.mrb[3].mxu1 }
 0x13a   : > { %309 = vst.msk [vmem:[#allocation2 + $0x20] sm:$0xf] %vm301_vm1, %v300_v23  ;;  %v311_v29 = vrot.slane %v300_v23, 4  ;;  %v368_v30 = vpack.c.bf16 %v356_v28, %v353_v21 }
 0x13b   : > { %v377_v31 = vrot.slane %v369_v26, 4  ;;  %380 = vst.msk [vmem:[#allocation2 + $0x30] sm:$0xf0] %vm373_vm2, %v369_v26  ;;  %v304_v32 = vrot.slane %v299_v27, 4 }
 0x13c   : > { %302 = vst.msk [vmem:[#allocation2] sm:$0xf] %vm301_vm1, %v299_v27  ;;  %314 = vst.msk [vmem:[#allocation2 + $0x30] sm:$0xf] %vm301_vm1, %v311_v29  ;;  %v371_v33 = vrot.slane %v368_v30, 4 }
 0x13d   : > { %375 = vst.msk [vmem:[#allocation2 + $0x10] sm:$0xf0] %vm373_vm2, %v368_v30  ;;  %379 = vst.msk [vmem:[#allocation2 + $0x20] sm:$0xf0] %vm373_vm2, %v377_v31  ;;  %v1049_v34 = vpop.f32.mrb[4].mxu0 }
 0x13e   : > { %307 = vst.msk [vmem:[#allocation2 + $0x10] sm:$0xf] %vm301_vm1, %v304_v32  ;;  %v1055_v35 = vpop.f32.mrb[4].mxu1  ;;  %v419_v36 = vpop.f32.mrb[5].mxu0 }
 0x13f   : > { %374 = vst.msk [vmem:[#allocation2] sm:$0xf0] %vm373_vm2, %v371_v33  ;;  %v484_v37 = vpop.f32.mrb[5].mxu1  ;;  %v1050_v38 = vpop.f32.mrb[6].mxu0 }
 0x140   : > { %v435_v39 = vpack.c.bf16 %v1050_v38, %v1049_v34  ;;  %v1056_v40 = vpop.f32.mrb[6].mxu1  ;;  %v422_v41 = vpop.f32.mrb[7].mxu0 }
 0x141   : > { %v500_v42 = vpack.c.bf16 %v1056_v40, %v1055_v35  ;;  %v434_v43 = vpack.c.bf16 %v422_v41, %v419_v36  ;;  %v487_v44 = vpop.f32.mrb[7].mxu1 }
 0x142   : > { %441 = vst.msk [vmem:[#allocation2 + $0x28] sm:$0xf] %vm301_vm1, %v435_v39  ;;  %v443_v45 = vrot.slane %v435_v39, 4  ;;  %v499_v46 = vpack.c.bf16 %v487_v44, %v484_v37 }
 0x143   : > { %v507_v47 = vrot.slane %v500_v42, 4  ;;  %510 = vst.msk [vmem:[#allocation2 + $0x38] sm:$0xf0] %vm373_vm2, %v500_v42  ;;  %v438_v48 = vrot.slane %v434_v43, 4  ;;  %v731_v55 = vld [vmem:[#allocation2 + $0x30] sm:$0xff] }
 0x144   : > { %436 = vst.msk [vmem:[#allocation2 + $0x8] sm:$0xf] %vm301_vm1, %v434_v43  ;;  %445 = vst.msk [vmem:[#allocation2 + $0x38] sm:$0xf] %vm301_vm1, %v443_v45  ;;  %v502_v49 = vrot.slane %v499_v46, 4  ;;  %v657_v54 = vld [vmem:[#allocation2 + $0x20] sm:$0xff] }
 0x145   : > { %505 = vst.msk [vmem:[#allocation2 + $0x18] sm:$0xf0] %vm373_vm2, %v499_v46  ;;  %v583_v50 = vld [vmem:[#allocation2 + $0x10] sm:$0xff]  ;;  %509 = vst.msk [vmem:[#allocation2 + $0x28] sm:$0xf0] %vm373_vm2, %v507_v47 }
 0x146   : > { %440 = vst.msk [vmem:[#allocation2 + $0x18] sm:$0xf] %vm301_vm1, %v438_v48  ;;  %v511_v51 = vld [vmem:[#allocation2] sm:$0xff]  ;;  %1065 = vmatprep.mubr.msk.bf16.mxu1 %vm243_vm0, %v583_v50 }
 0x147   : > { %504 = vst.msk [vmem:[#allocation2 + $0x8] sm:$0xf0] %vm373_vm2, %v502_v49  ;;  %1059 = vmatprep.mubr.msk.bf16.mxu0 %vm243_vm0, %v511_v51 }
 0x14b   : > { %v732_v56 = vld [vmem:[#allocation2 + $0x38] sm:$0xff] }
 0x14c   : > { %v658_v57 = vld [vmem:[#allocation2 + $0x28] sm:$0xff] }
 0x14d   : > { %v584_v52 = vld [vmem:[#allocation2 + $0x18] sm:$0xff] }
 0x14e   : > { %v512_v53 = vld [vmem:[#allocation2 + $0x8] sm:$0xff]  ;;  %1066 = vmatmul.mubr.msk.bf16.vlgmr.msra.gmra.mrb[8].mxu1 %vm243_vm0, %v584_v52 }
 0x14f   : > { %1060 = vmatmul.mubr.msk.bf16.vlgmr.msra.gmra.mrb[8].mxu0 %vm243_vm0, %v512_v53  ;;  %1076 = vmatpush3.bf16.msra.mxu1 %v1176_v17 }
 0x150   : > { %1070 = vmatpush3.bf16.msra.mxu0 %v1506_v16  ;;  %1071 = vmatprep.mubr.msk.bf16.mxu0 %vm243_vm0, %v657_v54 }
 0x151   : > { %1077 = vmatprep.mubr.msk.bf16.mxu1 %vm243_vm0, %v731_v55 }
 0x156   : > { %1078 = vmatmul.mubr.msk.bf16.vlgmr.msra.gmra.mrb[12].mxu1 %vm243_vm0, %v732_v56 }
 0x157   : > { %1072 = vmatmul.mubr.msk.bf16.vlgmr.msra.gmra.mrb[12].mxu0 %vm243_vm0, %v658_v57 }
 0x221   : > { %v1067_v58 = vpop.f32.mrb[8].mxu1 }
 0x222   : > { %v1061_v59 = vpop.f32.mrb[8].mxu0  ;;  %986 = vst [vmem:[%s1535_s11 + $0x30] sm:$0xff] %v1067_v58  ;;  %v634_v60 = vpop.f32.mrb[9].mxu1 }
 0x223   : > { %979 = vst [vmem:[%s1535_s11 + $0x10] sm:$0xff] %v1061_v59  ;;  %v561_v61 = vpop.f32.mrb[9].mxu0  ;;  %984 = vst [vmem:[%s1535_s11 + $0x20] sm:$0xff] %v634_v60  ;;  %v1068_v62 = vpop.f32.mrb[10].mxu1 }
 0x224   : > { %576 = vst [vmem:[%s1535_s11] sm:$0xff] %v561_v61  ;;  %v1062_v63 = vpop.f32.mrb[10].mxu0  ;;  %987 = vst [vmem:[%s1535_s11 + $0x38] sm:$0xff] %v1068_v62  ;;  %v637_v0 = vpop.f32.mrb[11].mxu1 }
 0x225   : > { %980 = vst [vmem:[%s1535_s11 + $0x18] sm:$0xff] %v1062_v63  ;;  %v564_v1 = vpop.f32.mrb[11].mxu0  ;;  %985 = vst [vmem:[%s1535_s11 + $0x28] sm:$0xff] %v637_v0 }
 0x226   : > { %978 = vst [vmem:[%s1535_s11 + $0x8] sm:$0xff] %v564_v1 }
 0x229   : > { %v1079_v2 = vpop.f32.mrb[12].mxu1 }
 0x22a   : > { %v1073_v3 = vpop.f32.mrb[12].mxu0  ;;  %1000 = vst [vmem:[%s1535_s11 + $0x70] sm:$0xff] %v1079_v2  ;;  %v782_v4 = vpop.f32.mrb[13].mxu1 }
 0x22b   : > { %993 = vst [vmem:[%s1535_s11 + $0x50] sm:$0xff] %v1073_v3  ;;  %v708_v5 = vpop.f32.mrb[13].mxu0  ;;  %998 = vst [vmem:[%s1535_s11 + $0x60] sm:$0xff] %v782_v4  ;;  %v1080_v6 = vpop.f32.mrb[14].mxu1 }
 0x22c   : > { %991 = vst [vmem:[%s1535_s11 + $0x40] sm:$0xff] %v708_v5  ;;  %v1074_v7 = vpop.f32.mrb[14].mxu0  ;;  %1001 = vst [vmem:[%s1535_s11 + $0x78] sm:$0xff] %v1080_v6  ;;  %v785_v8 = vpop.f32.mrb[15].mxu1 }
 0x22d   : > { %994 = vst [vmem:[%s1535_s11 + $0x58] sm:$0xff] %v1074_v7  ;;  %v711_v9 = vpop.f32.mrb[15].mxu0  ;;  %999 = vst [vmem:[%s1535_s11 + $0x68] sm:$0xff] %v785_v8 }
 0x22e   : > { %992 = vst [vmem:[%s1535_s11 + $0x48] sm:$0xff] %v711_v9 }
 0x22f   : > { %s1008_s26 = sshll.u32 %s1285_s15, 9  ;;  %s837_s7 = sshll.u32 %s1535_s11, 4  ;;  %s838_s7 = int_to_ptr.vmem [resolvable:$true] %s837_s7 }
 0x230   : > { %s820_s19 = scalar_lea.hbm %s1599_s3, %s1008_s26  ;;  %s1301_s25 = smov 512  }
 0x231   : > { %1087 = sst [smem:[#allocation10]] (%p1424_p10), %s1301_s25  ;;  %s1302_s27 = smov 1024  }
 0x232   : > { %1088 = sst [smem:[#allocation10 + $0x1]] (%p1424_p10), %s1302_s27  ;;  %s1303_s29 = smov 4  }
 0x233   : > { %1089 = sst [smem:[#allocation10 + $0x2]] (%p1424_p10), %s1303_s29  ;;  %s1304_s4 = smov 128  }
 0x234   : > { %1090 = sst [smem:[#allocation10 + $0x3]] (%p1424_p10), %s1304_s4  ;;  %s1305_s15 = smov 8  }
 0x235   : > { %1091 = sst [smem:[#allocation10 + $0x4]] (%p1424_p10), %s1304_s4  ;;  %s1306_s6 = smov [#allocation9]  }
 0x236   : > { %1092 = sst [smem:[#allocation10 + $0x5]] (%p1424_p10), %s1305_s15  ;;  %s1307_s24 = smov 0  }
 0x237   : > { %1093 = dma.general (%p1424_p10), %s838_s7, 2048, %s820_s19, %s806_s18, %s1306_s6, [#allocation10], %s1307_s24, 0  }
 0x238 PF: > { %s865_s9 = sand.u32 1, %s1273_s12   ;;  %p1617_p13 = scmp.ne.s32.totalorder %s1607_s23, 0 }
 0x239   : > { %p1618_p6 = scmp.ge.s32.totalorder %s1293_s17, 2  ;;  %s866_s22 = scalar_lea.sflag [#allocation5], %s865_s9 }
 0x23b   : > { %p1104_p8 = pnand %p1618_p6, %p1617_p13 }
 0x23d   : > { %1268 = dma.done.wait (!%p1104_p8), %s866_s22, 2048  }
 0x23e   : > { %1270 = vsyncadd (!%p1104_p8), %s866_s22, 4294965248  ;;  %s20_s17 = sadd.s32 1, %s1293_s17   ;;  %s1619_s12 = smov %s1277_s13 }
 0x23f   : > { %p17_p12 = scmp.ge.s32.totalorder %s20_s17, 4   ;;  %s1620_s13 = smov %s1281_s14 }
 0x240   : > { %s1621_s14 = smov %s1433_s5  ;;  %s1622_s15 = smov %s1289_s16 }
 0x241   : > { %s1623_s16 = smov %s1625_s28  ;;  %19 = sbr.rel (!%p17_p12) target bundleno = 7 (0x7), region = 110 }
 0x248   :  { %871 = vsyncpa [#allocation4], 1 }
 0x249   :  { %873 = vsyncpa [#allocation4 + $0x1], 1 }
 0x24a   :  { %874 = vsyncpa [#allocation7], 1 }
 0x24b   :  { %875 = vsyncpa [#allocation5], 1 }
 0x24c   :  { %877 = vsyncpa [#allocation5 + $0x1], 1 }

</bundles_post_ra>
